<compile_context>
chip_gen: v5e
topology: v5e:2x2
jax: 0.10.0
libtpu: 0.0.40
codegen_flags: <defaults>
</compile_context>

<pallas_src>
import functools
import math

import jax
import jax.numpy as jnp
from jax import lax
from jax.experimental import pallas as pl
from jax.experimental.pallas import tpu as pltpu


def _round_up(x, n):
    return ((x + n - 1) // n) * n


def _cosface_kernel(x_ref, w_ref, xr_ref, wr_ref, label_ref, out_ref, *, s, m):
    # Raw (un-normalized) dot product on the MXU, f32 accumulation.
    raw = lax.dot_general(
        x_ref[...], w_ref[...],
        dimension_numbers=(((1,), (1,)), ((), ())),
        preferred_element_type=jnp.float32,
    )  # (tb, tc)

    # cosine[i, j] = <x_i, w_j> / (||x_i|| * ||w_j||)
    # Rescale with precomputed reciprocal norms: (tb,1) * (1,tc) lane broadcasts.
    cosine = raw * xr_ref[...] * wr_ref[...]

    tb, tc = out_ref.shape
    # Global class index of each output column (class axis is tiled).
    col = lax.broadcasted_iota(jnp.int32, (tb, tc), 1) + pl.program_id(1) * tc
    is_target = col == label_ref[...]  # (tb, 1) broadcast against (tb, tc)

    # (cosine - m*1{target}) * s  ==  cosine*s - 1{target}*(m*s)   (constants folded)
    out_ref[...] = cosine * jnp.float32(s) - jnp.where(
        is_target, jnp.float32(m * s), jnp.float32(0.0))


def cosface_forward(x, weight, label, *, s=30.0, m=0.4,
                    tb=None, tc=None, matmul_dtype=jnp.bfloat16):
    """Pallas CosFace forward.

    x:      (B, in_features)  float32
    weight: (out_features, in_features) float32
    label:  (B,) int32
    returns (B, out_features) float32
    """
    B, D = x.shape
    C, D2 = weight.shape
    assert D == D2

    eps = jnp.float32(1e-12)  # matches torch.nn.functional.normalize default eps
    # Reciprocal row L2 norms, computed once in f32 (rsqrt == 1/max(||v||, eps)).
    x_rnorm = lax.rsqrt(jnp.maximum(jnp.sum(x * x, axis=-1, keepdims=True),
                                    eps * eps)).astype(jnp.float32)          # (B, 1)
    w_rnorm = lax.rsqrt(jnp.maximum(jnp.sum(weight * weight, axis=-1),
                                    eps * eps)).astype(jnp.float32)          # (C,)
    w_rnorm = w_rnorm.reshape(1, C)                                          # (1, C)

    # Tile sizes (multiples of 8 / 128; sized well under VMEM on v5e/v6e/v7x).
    if tb is None:
        tb = min(256, _round_up(B, 8))
    if tc is None:
        tc = min(1024, _round_up(C, 128))
    Bp = _round_up(B, tb)
    Cp = _round_up(C, tc)

    # Matmul operands in bf16 (halves HBM bytes for W, native MXU rate); in a real
    # training setup the weight would be stored in bf16 so no cast is needed here.
    xm = x.astype(matmul_dtype)
    wm = weight.astype(matmul_dtype)

    label2d = label.astype(jnp.int32).reshape(B, 1)
    if Bp != B:
        xm = jnp.pad(xm, ((0, Bp - B), (0, 0)))
        x_rnorm = jnp.pad(x_rnorm, ((0, Bp - B), (0, 0)))
        label2d = jnp.pad(label2d, ((0, Bp - B), (0, 0)), constant_values=-1)
    if Cp != C:
        wm = jnp.pad(wm, ((0, Cp - C), (0, 0)))
        w_rnorm = jnp.pad(w_rnorm, ((0, 0), (0, Cp - C)))

    kernel = functools.partial(_cosface_kernel, s=float(s), m=float(m))

    out = pl.pallas_call(
        kernel,
        out_shape=jax.ShapeDtypeStruct((Bp, Cp), jnp.float32),
        grid=(Bp // tb, Cp // tc),
        in_specs=[
            pl.BlockSpec((tb, D), lambda i, j: (i, 0)),   # x tile (reused over j)
            pl.BlockSpec((tc, D), lambda i, j: (j, 0)),   # weight tile (streamed)
            pl.BlockSpec((tb, 1), lambda i, j: (i, 0)),   # 1/||x_i||
            pl.BlockSpec((1, tc), lambda i, j: (0, j)),   # 1/||w_j||
            pl.BlockSpec((tb, 1), lambda i, j: (i, 0)),   # labels (indexed by i only)
        ],
        out_specs=pl.BlockSpec((tb, tc), lambda i, j: (i, j)),
        compiler_params=pltpu.CompilerParams(
            dimension_semantics=("parallel", "parallel"),
            vmem_limit_bytes=48 * 1024 * 1024,
        ),
    )(xm, wm, x_rnorm, w_rnorm, label2d)

    return out[:B, :C]


def _reference(x, weight, label, *, s=30.0, m=0.4):
    eps = 1e-12
    xn = x / jnp.maximum(jnp.linalg.norm(x, axis=-1, keepdims=True), eps)
    wn = weight / jnp.maximum(jnp.linalg.norm(weight, axis=-1, keepdims=True), eps)
    cosine = jnp.matmul(xn, wn.T, precision=lax.Precision.HIGHEST)
    phi = cosine - m
    onehot = jax.nn.one_hot(label, weight.shape[0], dtype=jnp.bool_)
    return jnp.where(onehot, phi, cosine) * s


if __name__ == "__main__":
    B = 8               # batch
    in_features = 128   # embedding size
    out_features = 256  # number of classes
    s_scale, margin = 30.0, 0.4

    key = jax.random.PRNGKey(0)
    k_x, k_w, k_l = jax.random.split(key, 3)

    x = jax.random.normal(k_x, (B, in_features), dtype=jnp.float32)

    # Deterministic Xavier-uniform init for weight (out_features, in_features).
    bound = math.sqrt(6.0 / (in_features + out_features))
    weight = jax.random.uniform(
        k_w, (out_features, in_features), dtype=jnp.float32,
        minval=-bound, maxval=bound)

    label = jax.random.randint(k_l, (B,), 0, out_features, dtype=jnp.int32)

    ref = _reference(x, weight, label, s=s_scale, m=margin)

    # Default production path: bf16 matmul operands (f32 accumulation).
    out_bf16 = jax.block_until_ready(
        cosface_forward(x, weight, label, s=s_scale, m=margin))
    assert out_bf16.shape == (B, out_features)
    assert jnp.allclose(out_bf16, ref, atol=1e-1, rtol=2e-2), \
        float(jnp.max(jnp.abs(out_bf16 - ref)))

    # f32 matmul path: tighter numerical check of the kernel structure.
    out_f32 = jax.block_until_ready(
        cosface_forward(x, weight, label, s=s_scale, m=margin,
                        matmul_dtype=jnp.float32))
    assert out_f32.shape == (B, out_features)
    assert jnp.allclose(out_f32, ref, atol=1e-3, rtol=1e-3), \
        float(jnp.max(jnp.abs(out_f32 - ref)))

    print("KERNEL_OK")
</pallas_src>

<mosaic_0001>
module attributes {stable_mosaic.version = 11 : i64} {
  func.func @_cosface_kernel(%arg0: i32, %arg1: i32, %arg2: memref<8x128xbf16, #tpu.memory_space<vmem>>, %arg3: memref<256x128xbf16, #tpu.memory_space<vmem>>, %arg4: memref<8x1xf32, #tpu.memory_space<vmem>>, %arg5: memref<1x256xf32, #tpu.memory_space<vmem>>, %arg6: memref<8x1xi32, #tpu.memory_space<vmem>>, %arg7: memref<8x256xf32, #tpu.memory_space<vmem>>) attributes {dimension_semantics = [#tpu.dimension_semantics<parallel>, #tpu.dimension_semantics<parallel>], iteration_bounds = array<i64: 1, 1>, scalar_prefetch = 0 : i64, scratch_operands = 0 : i64, tpu.core_type = #tpu.core_type<tc>, window_params = [{transform_indices = @transform_0, window_bounds = array<i64: 8, 128>}, {transform_indices = @transform_1, window_bounds = array<i64: 256, 128>}, {transform_indices = @transform_2, window_bounds = array<i64: 8, 1>}, {transform_indices = @transform_3, window_bounds = array<i64: 1, 256>}, {transform_indices = @transform_4, window_bounds = array<i64: 8, 1>}, {transform_indices = @transform_5, window_bounds = array<i64: 8, 256>}]} {
    %c0 = arith.constant 0 : index
    %c0_0 = arith.constant 0 : index
    %0 = vector.load %arg2[%c0, %c0_0] : memref<8x128xbf16, #tpu.memory_space<vmem>>, vector<8x128xbf16>
    %c0_1 = arith.constant 0 : index
    %c0_2 = arith.constant 0 : index
    %1 = vector.load %arg3[%c0_1, %c0_2] : memref<256x128xbf16, #tpu.memory_space<vmem>>, vector<256x128xbf16>
    %cst = arith.constant dense<0.000000e+00> : vector<8x256xf32>
    %2 = tpu.matmul %0, %1, %cst {dimension_numbers = #tpu.dot_dimension_numbers<[1], [1], [0], [0], [0, 0, 1, 0], [], []>} : vector<8x128xbf16>, vector<256x128xbf16>, vector<8x256xf32> -> vector<8x256xf32>
    %c0_3 = arith.constant 0 : index
    %c0_4 = arith.constant 0 : index
    %3 = vector.load %arg4[%c0_3, %c0_4] : memref<8x1xf32, #tpu.memory_space<vmem>>, vector<8x1xf32>
    %4 = vector.broadcast %3 : vector<8x1xf32> to vector<8x256xf32>
    %5 = arith.mulf %2, %4 : vector<8x256xf32>
    %c0_5 = arith.constant 0 : index
    %c0_6 = arith.constant 0 : index
    %6 = vector.load %arg5[%c0_5, %c0_6] : memref<1x256xf32, #tpu.memory_space<vmem>>, vector<1x256xf32>
    %7 = vector.broadcast %6 : vector<1x256xf32> to vector<8x256xf32>
    %8 = arith.mulf %5, %7 : vector<8x256xf32>
    %9 = tpu.iota {dimensions = array<i32: 1>} : vector<8x256xi32>
    %c256_i32 = arith.constant 256 : i32
    %10 = arith.muli %arg1, %c256_i32 : i32
    %11 = vector.broadcast %10 : i32 to vector<8x256xi32>
    %12 = arith.addi %9, %11 : vector<8x256xi32>
    %c0_7 = arith.constant 0 : index
    %c0_8 = arith.constant 0 : index
    %13 = vector.load %arg6[%c0_7, %c0_8] : memref<8x1xi32, #tpu.memory_space<vmem>>, vector<8x1xi32>
    %14 = vector.broadcast %13 : vector<8x1xi32> to vector<8x256xi32>
    %15 = arith.cmpi eq, %12, %14 : vector<8x256xi32>
    %cst_9 = arith.constant 3.000000e+01 : f32
    %16 = vector.broadcast %cst_9 : f32 to vector<8x256xf32>
    %17 = arith.mulf %8, %16 : vector<8x256xf32>
    %cst_10 = arith.constant 1.200000e+01 : f32
    %cst_11 = arith.constant 0.000000e+00 : f32
    %18 = vector.broadcast %cst_10 : f32 to vector<8x256xf32>
    %19 = vector.broadcast %cst_11 : f32 to vector<8x256xf32>
    %20 = arith.select %15, %18, %19 : vector<8x256xi1>, vector<8x256xf32>
    %21 = arith.subf %17, %20 : vector<8x256xf32>
    %c0_12 = arith.constant 0 : index
    %c0_13 = arith.constant 0 : index
    %22 = vector.load %arg7[%c0_12, %c0_13] : memref<8x256xf32, #tpu.memory_space<vmem>>, vector<8x256xf32>
    tpu.vector_store %arg7[%c0_12, %c0_13], %21 {strides = array<i32>} : memref<8x256xf32, #tpu.memory_space<vmem>>, vector<8x256xf32>,
    return
  }
  func.func @transform_0(%arg0: i32, %arg1: i32) -> (i32, i32) {
    %c0_i32 = arith.constant 0 : i32
    %c0_i32_0 = arith.constant 0 : i32
    return %arg0, %c0_i32 : i32, i32
  }
  func.func @transform_1(%arg0: i32, %arg1: i32) -> (i32, i32) {
    %c0_i32 = arith.constant 0 : i32
    %c0_i32_0 = arith.constant 0 : i32
    return %arg1, %c0_i32 : i32, i32
  }
  func.func @transform_2(%arg0: i32, %arg1: i32) -> (i32, i32) {
    %c0_i32 = arith.constant 0 : i32
    %c0_i32_0 = arith.constant 0 : i32
    return %arg0, %c0_i32 : i32, i32
  }
  func.func @transform_3(%arg0: i32, %arg1: i32) -> (i32, i32) {
    %c0_i32 = arith.constant 0 : i32
    %c0_i32_0 = arith.constant 0 : i32
    return %c0_i32, %arg1 : i32, i32
  }
  func.func @transform_4(%arg0: i32, %arg1: i32) -> (i32, i32) {
    %c0_i32 = arith.constant 0 : i32
    %c0_i32_0 = arith.constant 0 : i32
    return %arg0, %c0_i32 : i32, i32
  }
  func.func @transform_5(%arg0: i32, %arg1: i32) -> (i32, i32) {
    %c0_i32 = arith.constant 0 : i32
    return %arg0, %arg1 : i32, i32
  }
}

</mosaic_0001>

<bundles_post_ra>
// kernel: tpu_custom_call.1
= control target key start
LH: loop header
LB: loop body
LE: loop exit
PB: predicated region body
PF: predicated region fallthrough
CT: control target
= control target key end

     0   :  { %10 = vsyncpa [#allocation3], 0  ;;  %s439_s0 = inlined_call_operand.vmem [shape: bf16[8,128], index: 0, kind: input, shape index: {}]   ;;  %s440_s1 = inlined_call_operand.hbm [shape: bf16[256,128], index: 1, kind: input, shape index: {}]   ;;  %s441_s2 = inlined_call_operand.vmem [shape: f32[8,1], index: 2, kind: input, shape index: {}]   ;;  %s442_s3 = inlined_call_operand.vmem [shape: f32[1,256], index: 3, kind: input, shape index: {}]   ;;  %s443_s4 = inlined_call_operand.vmem [shape: s32[8,1], index: 4, kind: input, shape index: {}]   ;;  %s444_s5 = inlined_call_operand.hbm [shape: f32[8,256], index: 5, kind: output, shape index: {}]  }
   0x1   :  { %11 = vsyncpa [#allocation4], 0  ;;  %s18_s20 = sshll.u32 %s440_s1, 4  ;;  %s385_s21 = smov [#allocation2]   ;;  %s19_s20 = int_to_ptr.hbm [resolvable:$true] %s18_s20 }
   0x2   :  { %s20_s22 = sshll.u32 %s385_s21, 4  ;;  %s386_s23 = smov 64   ;;  %s21_s22 = int_to_ptr.vmem [resolvable:$true] %s20_s22 }
   0x3   :  { %s387_s24 = smov 4  }
   0x4   :  { %26 = dma.hbm_to_vmem [thread:$0]  %s19_s20, 2048, %s21_s22, [#allocation3], %s386_s23, %s386_s23, %s387_s24  }
   0x5   :  { %381 = dma.done.wait [#allocation3], 2048  }
   0x6   :  { %382 = vsyncadd [#allocation3], 4294965248  ;;  %v317_v0 = vld [vmem:[#allocation2 + $0x38] sm:$0xff]  ;;  %v316_v2 = vld [vmem:[#allocation2 + $0x30] sm:$0xff]  ;;  %v388_v9 = vmov 0   ;;  %v208_v21 = vlaneseq  ;;  %v390_v36 = vmov 0.0  }
   0x7   :  { %v325_v1 = vld [vmem:[#allocation2 + $0x78] sm:$0xff]  ;;  %166 = vmatpush.bf16.xpose.msra.mxu0 %v317_v0  ;;  %v324_v3 = vld [vmem:[#allocation2 + $0x70] sm:$0xff]  ;;  %v315_v4 = vld [vmem:[#allocation2 + $0x28] sm:$0xff]  ;;  %332 = vset.pattern.permute.xlu0 %v388_v9 }
   0x8   :  { %179 = vmatpush.bf16.xpose.msra.mxu1 %v325_v1  ;;  %v323_v5 = vld [vmem:[#allocation2 + $0x68] sm:$0xff]  ;;  %v314_v6 = vld [vmem:[#allocation2 + $0x20] sm:$0xff]  ;;  %v313_v10 = vld [vmem:[#allocation2 + $0x18] sm:$0xff]  ;;  %v209_v22 = vand.u32 127, %v208_v21 }
   0x9   :  { %v322_v7 = vld [vmem:[#allocation2 + $0x60] sm:$0xff]  ;;  %v321_v11 = vld [vmem:[#allocation2 + $0x58] sm:$0xff]  ;;  %v312_v13 = vld [vmem:[#allocation2 + $0x10] sm:$0xff] }
   0xa   :  { %v192_v8 = vld [vmem:[%s441_s2] sm:$0xff]  ;;  %v320_v14 = vld [vmem:[#allocation2 + $0x50] sm:$0xff]  ;;  %v311_v15 = vld [vmem:[#allocation2 + $0x8] sm:$0xff]  ;;  %v210_v24 = vadd.s32 128, %v209_v22 }
   0xb   :  { %195 = vperm.xlu0 %332, %v192_v8   ;;  %v215_v12 = vld [vmem:[%s443_s4] sm:$0xff]  ;;  %v319_v16 = vld [vmem:[#allocation2 + $0x48] sm:$0xff] }
   0xc   :  { %v310_v17 = vld [vmem:[#allocation2] sm:$0xff] }
   0xd   :  { %v318_v18 = vld [vmem:[#allocation2 + $0x40] sm:$0xff] }
   0xe   :  { %v37_v19 = vld [vmem:[%s439_s0] sm:$0xf]  ;;  %s389_s0 = smov [#allocation5]  }
   0xf   :  { %167 = vmatpush.bf16.xpose.msra.mxu0 %v316_v2  ;;  %v200_v23 = vld [vmem:[%s442_s3] sm:$0x3]  ;;  %s234_s30 = sshll.u32 %s389_s0, 4  ;;  %s236_s3 = sshll.u32 %s444_s5, 4  ;;  %s235_s30 = int_to_ptr.vmem [resolvable:$true] %s234_s30  ;;  %s237_s3 = int_to_ptr.hbm [resolvable:$true] %s236_s3 }
  0x10   :  { %180 = vmatpush.bf16.xpose.msra.mxu1 %v324_v3  ;;  %v202_v26 = vperm.slane %v200_v23, 0  ;;  %v203_v27 = vperm.slane %v200_v23, 1 }
  0x13   :  { %217 = vperm.xlu0 %332, %v215_v12  }
  0x17   :  { %168 = vmatpush.bf16.xpose.msra.mxu0 %v315_v4 }
  0x18   :  { %181 = vmatpush.bf16.xpose.msra.mxu1 %v323_v5 }
  0x1f   :  { %169 = vmatpush.bf16.xpose.msra.mxu0 %v314_v6 }
  0x20   :  { %182 = vmatpush.bf16.xpose.msra.mxu1 %v322_v7 }
  0x27   :  { %170 = vmatpush.bf16.xpose.msra.mxu0 %v313_v10 }
  0x28   :  { %183 = vmatpush.bf16.xpose.msra.mxu1 %v321_v11 }
  0x2f   :  { %171 = vmatpush.bf16.xpose.msra.mxu0 %v312_v13 }
  0x30   :  { %184 = vmatpush.bf16.xpose.msra.mxu1 %v320_v14 }
  0x37   :  { %172 = vmatpush.bf16.xpose.msra.mxu0 %v311_v15 }
  0x38   :  { %185 = vmatpush.bf16.xpose.msra.mxu1 %v319_v16 }
  0x3f   :  { %173 = vmatpush.bf16.xpose.msra.mxu0 %v310_v17 }
  0x40   :  { %186 = vmatpush.bf16.xpose.msra.mxu1 %v318_v18 }
  0x46   :  { %174 = vmatmul.bf16.vlgmr.msra.gmra.mxu0 %v37_v19 }
  0x47   :  { %187 = vmatmul.bf16.vlgmr.msra.gmra.mxu1 %v37_v19 }
  0x7d   :  { %v196_v20 = vpop.permute.xlu0 %195 }
  0x85   :  { %v218_v25 = vpop.permute.xlu0 %217 }
  0x86   :  { %vm219_vm0 = vcmp.eq.s32.totalorder %v209_v22, %v218_v25  ;;  %vm220_vm1 = vcmp.eq.s32.totalorder %v210_v24, %v218_v25 }
  0x87   :  { %v223_v37 = vsel %vm219_vm0, 12.0, %v390_v36  ;;  %v224_v38 = vsel %vm220_vm1, 12.0, %v390_v36 }
  0xc3   :  { %v175_v28 = vpop.f32.mrf.mxu0 }
  0xc4   :  { %v188_v29 = vpop.f32.mrf.mxu1  ;;  %v198_v30 = vmul.f32 %v196_v20, %v175_v28 }
  0xc5   :  { %v199_v31 = vmul.f32 %v196_v20, %v188_v29 }
  0xc6   :  { %v206_v32 = vmul.f32 %v202_v26, %v198_v30 }
  0xc7   :  { %v207_v33 = vmul.f32 %v203_v27, %v199_v31 }
  0xc8   :  { %v221_v34 = vmul.f32 30.0, %v206_v32 }
  0xc9   :  { %v222_v35 = vmul.f32 30.0, %v207_v33 }
  0xca   :  { %v225_v39 = vsub.f32 %v221_v34, %v223_v37 }
  0xcb   :  { %v226_v40 = vsub.f32 %v222_v35, %v224_v38  ;;  %v177_v41 = vpop.f32.mrf.mxu0 }
  0xcc   :  { %v190_v42 = vpop.f32.mrf.mxu1  ;;  %227 = vst [vmem:[#allocation5] sm:$0xff] %v225_v39 }
  0xcd   :  { %228 = vst [vmem:[#allocation5 + $0x8] sm:$0xff] %v226_v40 }
  0xce   :  { %239 = dma.vmem_to_hbm [thread:$0]  %s235_s30, 256, %s237_s3, [#allocation4]  }
  0xcf   :  { %383 = dma.done.wait [#allocation4], 256  }
  0xd0   :  { %384 = vsyncadd [#allocation4], 4294967040 }
  0xd1   :  { %244 = vsyncpa [#allocation3], 1 }
  0xd2   :  { %245 = vsyncpa [#allocation4], 1 }

</bundles_post_ra>
